<compile_context>
chip_gen: v6e
topology: v6e:2x2x1
jax: 0.10.0
libtpu: 0.0.40
codegen_flags: <defaults>
</compile_context>

<pallas_src>
import jax
import jax.numpy as jnp
from jax.experimental import pallas as pl
from jax.experimental.pallas import tpu as pltpu


def _attn_kernel(q_ref, v_ref, out_ref, attn_ref):
    # q_ref: (B, To, H), v_ref: (B, Ti, H) per grid step (B batch elements).
    q = q_ref[...]          # native dtype, fed straight to the MXU
    v = v_ref[...]

    # attention_scores[b, t, s] = sum_h q[b, t, h] * v[b, s, h]
    # Contraction over the last dim of BOTH operands -> no V transpose needed.
    scores = jnp.einsum(
        "bqd,bkd->bqk", q, v,
        preferred_element_type=jnp.float32,
        precision=jax.lax.Precision.HIGHEST,
    )  # (B, To, Ti), f32 accumulate

    # Numerically stable softmax over Ti (matches F.softmax(dim=1) on the
    # flattened (N*To, Ti) view). All softmax math in f32, exact division.
    m = jnp.max(scores, axis=-1, keepdims=True)
    e = jnp.exp(scores - m)
    denom = jnp.sum(e, axis=-1, keepdims=True)
    attn = e / denom                                    # (B, To, Ti), f32

    # attention_output = attn @ v  -> (B, To, H); f32 accumulate on the MXU.
    out = jnp.einsum(
        "bqk,bkd->bqd", attn.astype(v.dtype), v,
        preferred_element_type=jnp.float32,
        precision=jax.lax.Precision.HIGHEST,
    )

    out_ref[...] = out.astype(out_ref.dtype)
    attn_ref[...] = attn.astype(attn_ref.dtype)


def _choose_batch_block(n, to, ti, h, q_itemsize, v_itemsize,
                        budget_bytes=8 << 20):
    """Largest divisor of n whose per-step VMEM footprint fits the budget."""
    # Double-buffered inputs + outputs, plus f32 intermediates (scores/attn, out).
    per_b = 2 * (to * h * q_itemsize        # q block
                 + ti * h * v_itemsize      # v block
                 + to * h * q_itemsize      # out block
                 + to * ti * q_itemsize)    # attn block
    per_b += 4 * (to * ti + to * h)         # f32 values held inside the kernel
    max_b = max(1, budget_bytes // max(per_b, 1))
    for b in range(min(n, max_b), 0, -1):
        if n % b == 0:
            return b
    return 1


def dot_product_attention(queries, values, *, batch_block=None):
    """queries: (N, To, H), values: (N, Ti, H) -> (output (N,To,H), attn (N,To,Ti))."""
    n, to, h = queries.shape
    nv, ti, hv = values.shape
    assert n == nv and h == hv, "queries/values batch or hidden mismatch"

    if batch_block is None:
        batch_block = _choose_batch_block(
            n, to, ti, h, queries.dtype.itemsize, values.dtype.itemsize
        )
    bb = int(batch_block)
    assert n % bb == 0, "batch_block must divide N"
    grid = (n // bb,)

    out_shapes = (
        jax.ShapeDtypeStruct((n, to, h), queries.dtype),
        jax.ShapeDtypeStruct((n, to, ti), queries.dtype),
    )

    return pl.pallas_call(
        _attn_kernel,
        out_shape=out_shapes,
        grid_spec=pltpu.PrefetchScalarGridSpec(
            num_scalar_prefetch=0,
            grid=grid,
            in_specs=[
                pl.BlockSpec((bb, to, h), lambda b: (b, 0, 0)),
                pl.BlockSpec((bb, ti, h), lambda b: (b, 0, 0)),
            ],
            out_specs=[
                pl.BlockSpec((bb, to, h), lambda b: (b, 0, 0)),
                pl.BlockSpec((bb, to, ti), lambda b: (b, 0, 0)),
            ],
        ),
        compiler_params=pltpu.CompilerParams(
            dimension_semantics=("parallel",),   # batch work shards across TCs (v7x)
        ),
    )(queries, values)


def _reference(queries, values):
    scores = jnp.einsum("nth,nsh->nts", queries, values, precision="highest")
    attn = jax.nn.softmax(scores, axis=-1)
    out = jnp.einsum("nts,nsh->nth", attn, values, precision="highest")
    return out, attn


if __name__ == "__main__":
    key = jax.random.PRNGKey(0)
    kq, kv = jax.random.split(key)

    N, To, Ti, H = 2, 8, 16, 32
    queries = jax.random.normal(kq, (N, To, H), dtype=jnp.float32)
    values = jax.random.normal(kv, (N, Ti, H), dtype=jnp.float32)

    out, attn = dot_product_attention(queries, values)
    out = jax.block_until_ready(out)
    attn = jax.block_until_ready(attn)

    ref_out, ref_attn = _reference(queries, values)
    assert out.shape == (N, To, H) and attn.shape == (N, To, Ti)
    assert jnp.allclose(out, ref_out, atol=1e-3, rtol=1e-3), (
        "output mismatch, max abs err = "
        f"{float(jnp.max(jnp.abs(out - ref_out)))}"
    )
    assert jnp.allclose(attn, ref_attn, atol=1e-3, rtol=1e-3), (
        "attention mismatch, max abs err = "
        f"{float(jnp.max(jnp.abs(attn - ref_attn)))}"
    )

    print("KERNEL_OK")
</pallas_src>

<mosaic_0001>
module attributes {stable_mosaic.version = 11 : i64} {
  func.func @_attn_kernel(%arg0: i32, %arg1: memref<2x8x32xf32, #tpu.memory_space<vmem>>, %arg2: memref<2x16x32xf32, #tpu.memory_space<vmem>>, %arg3: memref<2x8x32xf32, #tpu.memory_space<vmem>>, %arg4: memref<2x8x16xf32, #tpu.memory_space<vmem>>) attributes {dimension_semantics = [#tpu.dimension_semantics<parallel>], iteration_bounds = array<i64: 1>, scalar_prefetch = 0 : i64, scratch_operands = 0 : i64, tpu.core_type = #tpu.core_type<tc>, window_params = [{transform_indices = @transform_0, window_bounds = array<i64: 2, 8, 32>}, {transform_indices = @transform_1, window_bounds = array<i64: 2, 16, 32>}, {transform_indices = @transform_2, window_bounds = array<i64: 2, 8, 32>}, {transform_indices = @transform_3, window_bounds = array<i64: 2, 8, 16>}]} {
    %c0 = arith.constant 0 : index
    %c0_0 = arith.constant 0 : index
    %c0_1 = arith.constant 0 : index
    %0 = vector.load %arg1[%c0, %c0_0, %c0_1] : memref<2x8x32xf32, #tpu.memory_space<vmem>>, vector<2x8x32xf32>
    %c0_2 = arith.constant 0 : index
    %c0_3 = arith.constant 0 : index
    %c0_4 = arith.constant 0 : index
    %1 = vector.load %arg2[%c0_2, %c0_3, %c0_4] : memref<2x16x32xf32, #tpu.memory_space<vmem>>, vector<2x16x32xf32>
    "tpu.trace_start"() <{level = 10 : i32, message = "bqd,bkd->bqk"}> : () -> ()
    %cst = arith.constant dense<0.000000e+00> : vector<2x8x16xf32>
    %2 = tpu.matmul %0, %1, %cst {dimension_numbers = #tpu.dot_dimension_numbers<[2], [2], [1], [1], [0, 0, 0, 1, 1, 1], [0], [0]>, precision = #tpu.contract_precision<fp32>} : vector<2x8x32xf32>, vector<2x16x32xf32>, vector<2x8x16xf32> -> vector<2x8x16xf32>
    "tpu.trace_stop"() : () -> ()
    %cst_5 = arith.constant dense<0xFF800000> : vector<2x8xf32>
    %3 = vector.multi_reduction <maximumf>, %2, %cst_5 [2] : vector<2x8x16xf32> to vector<2x8xf32>
    %4 = vector.shape_cast %3 : vector<2x8xf32> to vector<2x8x1xf32>
    %5 = vector.broadcast %4 : vector<2x8x1xf32> to vector<2x8x16xf32>
    %6 = arith.subf %2, %5 : vector<2x8x16xf32>
    %7 = math.exp %6 : vector<2x8x16xf32>
    %cst_6 = arith.constant dense<0.000000e+00> : vector<2x8xf32>
    %8 = vector.multi_reduction <add>, %7, %cst_6 [2] : vector<2x8x16xf32> to vector<2x8xf32>
    %9 = vector.shape_cast %8 : vector<2x8xf32> to vector<2x8x1xf32>
    %10 = vector.broadcast %9 : vector<2x8x1xf32> to vector<2x8x16xf32>
    %11 = arith.divf %7, %10 : vector<2x8x16xf32>
    "tpu.trace_start"() <{level = 10 : i32, message = "bqk,bkd->bqd"}> : () -> ()
    %cst_7 = arith.constant dense<0.000000e+00> : vector<2x8x32xf32>
    %12 = tpu.matmul %11, %1, %cst_7 {dimension_numbers = #tpu.dot_dimension_numbers<[2], [1], [1], [2], [0, 0, 0, 1, 1, 2], [0], [0]>, precision = #tpu.contract_precision<fp32>} : vector<2x8x16xf32>, vector<2x16x32xf32>, vector<2x8x32xf32> -> vector<2x8x32xf32>
    "tpu.trace_stop"() : () -> ()
    %c0_8 = arith.constant 0 : index
    %c0_9 = arith.constant 0 : index
    %c0_10 = arith.constant 0 : index
    %13 = vector.load %arg3[%c0_8, %c0_9, %c0_10] : memref<2x8x32xf32, #tpu.memory_space<vmem>>, vector<2x8x32xf32>
    tpu.vector_store %arg3[%c0_8, %c0_9, %c0_10], %12 {strides = array<i32>} : memref<2x8x32xf32, #tpu.memory_space<vmem>>, vector<2x8x32xf32>,
    %c0_11 = arith.constant 0 : index
    %c0_12 = arith.constant 0 : index
    %c0_13 = arith.constant 0 : index
    %14 = vector.load %arg4[%c0_11, %c0_12, %c0_13] : memref<2x8x16xf32, #tpu.memory_space<vmem>>, vector<2x8x16xf32>
    tpu.vector_store %arg4[%c0_11, %c0_12, %c0_13], %11 {strides = array<i32>} : memref<2x8x16xf32, #tpu.memory_space<vmem>>, vector<2x8x16xf32>,
    return
  }
  func.func @transform_0(%arg0: i32) -> (i32, i32, i32) {
    %c0_i32 = arith.constant 0 : i32
    %c0_i32_0 = arith.constant 0 : i32
    %c0_i32_1 = arith.constant 0 : i32
    return %arg0, %c0_i32, %c0_i32_0 : i32, i32, i32
  }
  func.func @transform_1(%arg0: i32) -> (i32, i32, i32) {
    %c0_i32 = arith.constant 0 : i32
    %c0_i32_0 = arith.constant 0 : i32
    %c0_i32_1 = arith.constant 0 : i32
    return %arg0, %c0_i32, %c0_i32_0 : i32, i32, i32
  }
  func.func @transform_2(%arg0: i32) -> (i32, i32, i32) {
    %c0_i32 = arith.constant 0 : i32
    %c0_i32_0 = arith.constant 0 : i32
    %c0_i32_1 = arith.constant 0 : i32
    return %arg0, %c0_i32, %c0_i32_0 : i32, i32, i32
  }
  func.func @transform_3(%arg0: i32) -> (i32, i32, i32) {
    %c0_i32 = arith.constant 0 : i32
    %c0_i32_0 = arith.constant 0 : i32
    %c0_i32_1 = arith.constant 0 : i32
    return %arg0, %c0_i32, %c0_i32_0 : i32, i32, i32
  }
}

</mosaic_0001>

<bundles_post_ra>
// kernel: tpu_custom_call.1
= control target key start
LH: loop header
LB: loop body
LE: loop exit
PB: predicated region body
PF: predicated region fallthrough
CT: control target
= control target key end

     0   :  { %9 = vsyncpa [#allocation3], 0  ;;  %s2571_s0 = inlined_call_operand.hbm [shape: f32[2,8,32], index: 0, kind: input, shape index: {}]   ;;  %s2572_s1 = inlined_call_operand.hbm [shape: f32[2,16,32], index: 1, kind: input, shape index: {}]   ;;  %s2573_s2 = inlined_call_operand.hbm [shape: f32[2,8,32], index: 2, kind: output, shape index: {0}]   ;;  %s2574_s3 = inlined_call_operand.hbm [shape: f32[2,8,16], index: 3, kind: output, shape index: {1}]  }
   0x1   :  { %10 = vsyncpa [#allocation6], 0 }
   0x2   :  { %11 = vsyncpa [#allocation4], 0 }
   0x3   :  { %12 = vsyncpa [#allocation9], 0  ;;  %s2315_s12 = smov [#allocation2]  }
   0x4   :  { %s18_s13 = sshll.u32 %s2315_s12, 4  ;;  %s19_s13 = int_to_ptr.vmem [resolvable:$true] %s18_s13 }
   0x5   :  { %s2235_s14 = scalar_lea.vmem %s19_s13, 256  ;;  %p2240_p1 = scmp.lt.s32.totalorder %s19_s13, %s19_s13 }
   0x6   :  { %p2236_p0 = scmp.ne.s32.totalorder %s19_s13, %s2235_s14  ;;  %p2241_p2 = scmp.lt.s32.totalorder %s2235_s14, %s2235_s14 }
   0x8   :  { %p2242_p3 = por %p2241_p2, %p2240_p1 }
   0xa   :  { %p2243_p4 = pnand %p2242_p3, %p2236_p0 }
   0xc   :  { %2246 = shalt.err (!%p2243_p4)
}
   0xd   :  { %s2316_s15 = smov 128   ;;  %s2317_s16 = smov 8  }
   0xe   :  { %24 = dma.hbm_to_vmem [thread:$0]  %s2571_s0, 256, %s19_s13, [#allocation3], %s2316_s15, %s2316_s15, %s2317_s16  }
   0xf   :  { %s2318_s19 = smov [#allocation5]  }
  0x10   :  { %s30_s20 = sshll.u32 %s2318_s19, 4  ;;  %s31_s20 = int_to_ptr.vmem [resolvable:$true] %s30_s20 }
  0x11   :  { %s2255_s21 = scalar_lea.vmem %s31_s20, 512  ;;  %p2260_p6 = scmp.lt.s32.totalorder %s31_s20, %s31_s20 }
  0x12   :  { %p2256_p5 = scmp.ne.s32.totalorder %s31_s20, %s2255_s21  ;;  %p2261_p7 = scmp.lt.s32.totalorder %s2255_s21, %s2255_s21 }
  0x14   :  { %p2262_p8 = por %p2261_p7, %p2260_p6 }
  0x16   :  { %p2263_p9 = pnand %p2262_p8, %p2256_p5 }
  0x18   :  { %2266 = shalt.err (!%p2263_p9)
}
  0x19   :  { %36 = dma.hbm_to_vmem [thread:$0]  %s2572_s1, 512, %s31_s20, [#allocation6], %s2316_s15, %s2316_s15, %s2317_s16  }
  0x1a   :  { %2307 = dma.done.wait [#allocation3], 256  }
  0x1b   :  { %2308 = vsyncadd [#allocation3], 4294967040 }
  0x1c   :  { %2309 = dma.done.wait [#allocation6], 512  }
  0x1d   :  { %2310 = vsyncadd [#allocation6], 4294966784  ;;  %v2319_v0 = vmov 0.0   ;;  %vm2320_vm0 = vmmov 0   ;;  %vm49_vm1 = vcmask 261120   ;;  %v2361_v1 = vld [vmem:[#allocation5 + $0x8] sm:$0xff] }
  0x1e   :  { %2043 = vmatprep.subr.mxu0 %v2319_v0  ;;  %2050 = vmatprep.subr.mxu1 %v2319_v0  ;;  %v2363_v2 = vld [vmem:[#allocation5] sm:$0xff]  ;;  %v43_v3 = vld [vmem:[#allocation2] sm:$0xff]  ;;  %v57_v4 = vsel %vm49_vm1, %v2361_v1, 0  ;;  %v2379_v20 = vld [vmem:[#allocation5 + $0x18] sm:$0xff]  ;;  %v2446_v43 = vand.u32 4294901760, %v2361_v1  ;;  %vm986_vm2 = vcmask 130048  }
  0x1f   :  { %2047 = vmatprep.mubr.msk.f32.mxu0 %vm2320_vm0, %v2319_v0  ;;  %2054 = vmatprep.mubr.msk.f32.mxu1 %vm2320_vm0, %v2319_v0  ;;  %v54_v5 = vsel %vm49_vm1, %v2363_v2, 0  ;;  %v88_v6 = vand.u32 4294901760, %v57_v4  ;;  %v51_v8 = vsel %vm49_vm1, %v43_v3, 0  ;;  %v44_v22 = vld [vmem:[#allocation2 + $0x8] sm:$0xff]  ;;  %v525_v24 = vsel %vm49_vm1, %v2379_v20, 0  ;;  %v2386_v25 = vld [vmem:[#allocation5 + $0x10] sm:$0xff] }
  0x20   :  { %v2369_v7 = vand.u32 4294901760, %v54_v5  ;;  %v2372_v9 = vand.u32 4294901760, %v51_v8  ;;  %v519_v26 = vsel %vm49_vm1, %v44_v22, 0  ;;  %v2390_v27 = vand.u32 4294901760, %v525_v24  ;;  %s2321_s0 = smov [#allocation8]  }
  0x21   :  { %2044 = vmatpush3.xpose.msra.mxu0 %v88_v6  ;;  %v166_v10 = vsub.f32 %v57_v4, %v88_v6  ;;  %v522_v28 = vsel %vm49_vm1, %v2386_v25, 0  ;;  %v2395_v29 = vand.u32 4294901760, %v519_v26  ;;  %v2454_v44 = vand.u32 4294901760, %v2363_v2  ;;  %s1954_s1 = sshll.u32 %s2321_s0, 4  ;;  %s1955_s1 = int_to_ptr.vmem [resolvable:$true] %s1954_s1 }
  0x22   :  { %v173_v11 = vsub.f32 %v54_v5, %v2369_v7  ;;  %2045 = vmatprep.subr.mxu0 %v2319_v0  ;;  %v127_v12 = vsub.f32 %v51_v8, %v2372_v9  ;;  %v634_v30 = vsub.f32 %v525_v24, %v2390_v27  ;;  %v2402_v31 = vand.u32 4294901760, %v522_v28  ;;  %s2267_s24 = scalar_lea.vmem %s1955_s1, 256  ;;  %p2272_p11 = scmp.lt.s32.totalorder %s1955_s1, %s1955_s1 }
  0x23   :  { %v167_v13 = vand.u32 4294901760, %v166_v10  ;;  %v595_v32 = vsub.f32 %v519_v26, %v2395_v29  ;;  %p2268_p10 = scmp.ne.s32.totalorder %s1955_s1, %s2267_s24  ;;  %p2273_p12 = scmp.lt.s32.totalorder %s2267_s24, %s2267_s24 }
  0x24   :  { %v174_v14 = vand.u32 4294901760, %v173_v11  ;;  %v128_v15 = vand.u32 4294901760, %v127_v12  ;;  %v641_v33 = vsub.f32 %v522_v28, %v2402_v31  ;;  %v635_v34 = vand.u32 4294901760, %v634_v30 }
  0x25   :  { %2046 = vmatpush3.xpose.msra.mxu0 %v2369_v7  ;;  %v168_v16 = vsub.f32 %v166_v10, %v167_v13  ;;  %v596_v35 = vand.u32 4294901760, %v595_v32  ;;  %p2274_p13 = por %p2273_p12, %p2272_p11 }
  0x26   :  { %v175_v17 = vsub.f32 %v173_v11, %v174_v14  ;;  %2057 = vmatprep.subr.mxu0 %v2319_v0  ;;  %v129_v18 = vsub.f32 %v127_v12, %v128_v15  ;;  %v636_v36 = vsub.f32 %v634_v30, %v635_v34  ;;  %v642_v37 = vand.u32 4294901760, %v641_v33 }
  0x27   :  { %v169_v19 = vand.u32 4294901760, %v168_v16  ;;  %v597_v38 = vsub.f32 %v595_v32, %v596_v35  ;;  %p2275_p0 = pnand %p2274_p13, %p2268_p10 }
  0x28   :  { %v130_v21 = vand.u32 4294901760, %v129_v18  ;;  %v176_v23 = vand.u32 4294901760, %v175_v17  ;;  %v637_v39 = vand.u32 4294901760, %v636_v36  ;;  %v643_v40 = vsub.f32 %v641_v33, %v642_v37 }
  0x29   :  { %2051 = vmatpush3.xpose.msra.mxu1 %v169_v19  ;;  %v598_v41 = vand.u32 4294901760, %v597_v38 }
  0x2a   :  { %2048 = vmatmul.mubr.f32.vlgmr.msra.gmra.mxu0 %v130_v21  ;;  %2052 = vmatprep.subr.mxu1 %v2319_v0  ;;  %v644_v42 = vand.u32 4294901760, %v643_v40 }
  0x2b   :  { %2058 = vmatpush3.xpose.msra.mxu0 %v166_v10  ;;  %2061 = vmatprep.mubr.msk.f32.mxu0 %vm2320_vm0, %v2319_v0 }
  0x2c   :  { %2059 = vmatprep.subr.mxu0 %v2319_v0 }
  0x2d   :  { %2053 = vmatpush3.xpose.msra.mxu1 %v176_v23 }
  0x2e   :  { %2064 = vmatprep.subr.mxu1 %v2319_v0 }
  0x2f   :  { %2060 = vmatpush3.xpose.msra.mxu0 %v173_v11 }
  0x30   :  { %2055 = vmatmul.mubr.f32.vlgmr.msra.gmra.mxu1 %v2372_v9  ;;  %2071 = vmatprep.subr.mxu0 %v2319_v0 }
  0x31   :  { %2065 = vmatpush3.xpose.msra.mxu1 %v88_v6  ;;  %2068 = vmatprep.mubr.msk.f32.mxu1 %vm2320_vm0, %v2319_v0 }
  0x32   :  { %2062 = vmatmul.mubr.f32.vlgmr.msra.gmra.mxu0 %v127_v12  ;;  %2066 = vmatprep.subr.mxu1 %v2319_v0 }
  0x33   :  { %2072 = vmatpush3.xpose.msra.mxu0 %v167_v13  ;;  %2075 = vmatprep.mubr.msk.f32.mxu0 %vm2320_vm0, %v2319_v0 }
  0x34   :  { %2073 = vmatprep.subr.mxu0 %v2319_v0 }
  0x35   :  { %2067 = vmatpush3.xpose.msra.mxu1 %v2369_v7 }
  0x36   :  { %2078 = vmatprep.subr.mxu1 %v2319_v0 }
  0x37   :  { %2074 = vmatpush3.xpose.msra.mxu0 %v174_v14 }
  0x38   :  { %2069 = vmatmul.mubr.f32.vlgmr.msra.gmra.mxu1 %v128_v15  ;;  %2085 = vmatprep.subr.mxu0 %v2319_v0 }
  0x39   :  { %2079 = vmatpush3.xpose.msra.mxu1 %v88_v6  ;;  %2082 = vmatprep.mubr.msk.f32.mxu1 %vm2320_vm0, %v2319_v0 }
  0x3a   :  { %2076 = vmatmul.mubr.f32.vlgmr.msra.gmra.mxu0 %v2372_v9  ;;  %2080 = vmatprep.subr.mxu1 %v2319_v0 }
  0x3b   :  { %2086 = vmatpush3.xpose.msra.mxu0 %v2390_v27  ;;  %2089 = vmatprep.mubr.msk.f32.mxu0 %vm2320_vm0, %v2319_v0 }
  0x3c   :  { %2087 = vmatprep.subr.mxu0 %v2319_v0 }
  0x3d   :  { %2081 = vmatpush3.xpose.msra.mxu1 %v2369_v7 }
  0x3e   :  { %2092 = vmatprep.subr.mxu1 %v2319_v0 }
  0x3f   :  { %2088 = vmatpush3.xpose.msra.mxu0 %v2402_v31 }
  0x40   :  { %2083 = vmatmul.mubr.f32.vlgmr.msra.gmra.mxu1 %v2372_v9  ;;  %2099 = vmatprep.subr.mxu0 %v2319_v0 }
  0x41   :  { %2093 = vmatpush3.xpose.msra.mxu1 %v637_v39  ;;  %2096 = vmatprep.mubr.msk.f32.mxu1 %vm2320_vm0, %v2319_v0 }
  0x42   :  { %2090 = vmatmul.mubr.f32.vlgmr.msra.gmra.mxu0 %v598_v41  ;;  %2094 = vmatprep.subr.mxu1 %v2319_v0  ;;  %v2481_v41 = vand.u32 4294901760, %v2386_v25 }
  0x43   :  { %2100 = vmatpush3.xpose.msra.mxu0 %v634_v30  ;;  %2103 = vmatprep.mubr.msk.f32.mxu0 %vm2320_vm0, %v2319_v0  ;;  %v1119_v30 = vsub.f32 %v2361_v1, %v2446_v43 }
  0x44   :  { %2101 = vmatprep.subr.mxu0 %v2319_v0 }
  0x45   :  { %2095 = vmatpush3.xpose.msra.mxu1 %v644_v42 }
  0x46   :  { %2106 = vmatprep.subr.mxu1 %v2319_v0 }
  0x47   :  { %2102 = vmatpush3.xpose.msra.mxu0 %v641_v33 }
  0x48   :  { %2097 = vmatmul.mubr.f32.vlgmr.msra.gmra.mxu1 %v2395_v29  ;;  %2113 = vmatprep.subr.mxu0 %v2319_v0 }
  0x49   :  { %2107 = vmatpush3.xpose.msra.mxu1 %v2390_v27  ;;  %2110 = vmatprep.mubr.msk.f32.mxu1 %vm2320_vm0, %v2319_v0 }
  0x4a   :  { %2104 = vmatmul.mubr.f32.vlgmr.msra.gmra.mxu0 %v595_v32  ;;  %2108 = vmatprep.subr.mxu1 %v2319_v0  ;;  %v1120_v32 = vand.u32 4294901760, %v1119_v30 }
  0x4b   :  { %2114 = vmatpush3.xpose.msra.mxu0 %v635_v34  ;;  %2117 = vmatprep.mubr.msk.f32.mxu0 %vm2320_vm0, %v2319_v0 }
  0x4c   :  { %2115 = vmatprep.subr.mxu0 %v2319_v0  ;;  %v1121_v34 = vsub.f32 %v1119_v30, %v1120_v32 }
  0x4d   :  { %2109 = vmatpush3.xpose.msra.mxu1 %v2402_v31 }
  0x4e   :  { %2120 = vmatprep.subr.mxu1 %v2319_v0  ;;  %v1122_v36 = vand.u32 4294901760, %v1121_v34 }
  0x4f   :  { %2116 = vmatpush3.xpose.msra.mxu0 %v642_v37 }
  0x50   :  { %2111 = vmatmul.mubr.f32.vlgmr.msra.gmra.mxu1 %v596_v35  ;;  %2127 = vmatprep.subr.mxu0 %v2319_v0 }
  0x51   :  { %2121 = vmatpush3.xpose.msra.mxu1 %v2390_v27  ;;  %2124 = vmatprep.mubr.msk.f32.mxu1 %vm2320_vm0, %v2319_v0 }
  0x52   :  { %2118 = vmatmul.mubr.f32.vlgmr.msra.gmra.mxu0 %v2395_v29  ;;  %2122 = vmatprep.subr.mxu1 %v2319_v0 }
  0x53   :  { %2128 = vmatpush3.msra.mxu0 %v2446_v43  ;;  %2131 = vmatprep.mubr.msk.f32.mxu0 %vm2320_vm0, %v2319_v0 }
  0x54   :  { %2129 = vmatprep.subr.mxu0 %v2319_v0 }
  0x55   :  { %2123 = vmatpush3.xpose.msra.mxu1 %v2402_v31  ;;  %2130 = vmatpush3.msra.mxu0 %v2454_v44  ;;  %v1126_v31 = vsub.f32 %v2363_v2, %v2454_v44  ;;  %v2478_v2 = vand.u32 4294901760, %v2379_v20 }
  0x56   :  { %2134 = vmatprep.subr.mxu1 %v2319_v0  ;;  %2141 = vmatprep.subr.mxu0 %v2319_v0 }
  0x57   :  { %v1127_v33 = vand.u32 4294901760, %v1126_v31 }
  0x58   :  { %2125 = vmatmul.mubr.f32.vlgmr.msra.gmra.mxu1 %v2395_v29 }
  0x59   :  { %2138 = vmatprep.mubr.msk.f32.mxu1 %vm2320_vm0, %v2319_v0  ;;  %v1128_v35 = vsub.f32 %v1126_v31, %v1127_v33  ;;  %2135 = vmatpush3.msra.mxu1 %v1122_v36 }
  0x5a   :  { %2136 = vmatprep.subr.mxu1 %v2319_v0 }
  0x5b   :  { %v1129_v37 = vand.u32 4294901760, %v1128_v35 }
  0x5d   :  { %2137 = vmatpush3.msra.mxu1 %v1129_v37 }
  0x5e   :  { %2148 = vmatprep.subr.mxu1 %v2319_v0 }
  0xea   :  { %v132_v45 = vpop.f32.mrf.mxu0 }
  0xec   :  { %v2049_v46 = vpop.f32.mrf.mxu0 }
  0xf0   :  { %v213_v47 = vpop.f32.mrf.mxu1 }
  0xf1   :  { %v214_v51 = vadd.f32 %v213_v47, %v132_v45  ;;  %v2485_v45 = vsub.f32 %v2379_v20, %v2478_v2 }
  0xf2   :  { %v2056_v48 = vpop.f32.mrf.mxu1  ;;  %v289_v49 = vpop.f32.mrf.mxu0 }
  0xf3   :  { %v290_v53 = vadd.f32 %v289_v49, %v214_v51  ;;  %v1582_v48 = vand.u32 4294901760, %v2485_v45  ;;  %v2492_v49 = vsub.f32 %v2386_v25, %v2481_v41 }
  0xf4   :  { %v2063_v50 = vpop.f32.mrf.mxu0 }
  0xf5   :  { %v1583_v51 = vsub.f32 %v2485_v45, %v1582_v48 }
  0xf8   :  { %v364_v52 = vpop.f32.mrf.mxu1 }
  0xf9   :  { %v365_v56 = vadd.f32 %v364_v52, %v290_v53  ;;  %v1589_v52 = vand.u32 4294901760, %v2492_v49 }
  0xfa   :  { %v2070_v54 = vpop.f32.mrf.mxu1  ;;  %v441_v55 = vpop.f32.mrf.mxu0 }
  0xfb   :  { %v442_v58 = vadd.f32 %v441_v55, %v365_v56  ;;  %v1584_v55 = vand.u32 4294901760, %v1583_v51  ;;  %v1590_v56 = vsub.f32 %v2492_v49, %v1589_v52 }
  0xfc   :  { %v2077_v57 = vpop.f32.mrf.mxu0 }
 0x100   :  { %v514_v59 = vpop.f32.mrf.mxu1 }
 0x101   :  { %v515_v60 = vadd.f32 %v514_v59, %v442_v58 }
 0x102   :  { %v2084_v61 = vpop.f32.mrf.mxu1  ;;  %v600_v62 = vpop.f32.mrf.mxu0 }
 0x103   :  { %v987_v63 = vsel %vm986_vm2, %v515_v60, -inf }
 0x104   :  { %988 = vmax.xlane.f32.xlu0 %v987_v63  ;;  %v2091_v3 = vpop.f32.mrf.mxu0 }
 0x108   :  { %v681_v4 = vpop.f32.mrf.mxu1 }
 0x109   :  { %v682_v8 = vadd.f32 %v681_v4, %v600_v62 }
 0x10a   :  { %v2098_v5 = vpop.f32.mrf.mxu1  ;;  %v757_v6 = vpop.f32.mrf.mxu0 }
 0x10b   :  { %v758_v10 = vadd.f32 %v757_v6, %v682_v8 }
 0x10c   :  { %v2105_v7 = vpop.f32.mrf.mxu0 }
 0x110   :  { %v832_v9 = vpop.f32.mrf.mxu1 }
 0x111   :  { %v833_v13 = vadd.f32 %v832_v9, %v758_v10 }
 0x112   :  { %v2112_v11 = vpop.f32.mrf.mxu1  ;;  %v909_v12 = vpop.f32.mrf.mxu0 }
 0x113   :  { %v910_v15 = vadd.f32 %v909_v12, %v833_v13 }
 0x114   :  { %v2119_v14 = vpop.f32.mrf.mxu0 }
 0x118   :  { %v982_v16 = vpop.f32.mrf.mxu1 }
 0x119   :  { %v983_v17 = vadd.f32 %v982_v16, %v910_v15 }
 0x11a   :  { %v2126_v18 = vpop.f32.mrf.mxu1 }
 0x11b   :  { %v990_v19 = vsel %vm986_vm2, %v983_v17, -inf }
 0x11c   :  { %991 = vmax.xlane.f32.xlu0 %v990_v19 }
 0x18d   :  { %v989_v21 = vpop.xlane.xlu0 %988 }
 0x18e   :  { %v993_v22 = vsub.f32 %v515_v60, %v989_v21 }
 0x190   :  { %v995_v23 = vmul.f32 1.442695, %v993_v22 }
 0x192   :  { %2219 = vpow2.f32 %v995_v23 }
 0x19f   :  { %v2220_v24 = vpop.eup %2219 }
 0x1a0   :  { %v999_v26 = vsel %vm986_vm2, %v2220_v24, 0.0 }
 0x1a1   :  { %1000 = vadd.xlane.f32.xlu1 %v999_v26 }
 0x1a5   :  { %v992_v27 = vpop.xlane.xlu0 %991 }
 0x1a6   :  { %v994_v28 = vsub.f32 %v983_v17, %v992_v27 }
 0x1a8   :  { %v997_v29 = vmul.f32 1.442695, %v994_v28 }
 0x1aa   :  { %2221 = vpow2.f32 %v997_v29 }
 0x1b7   :  { %v2222_v38 = vpop.eup %2221 }
 0x1b8   :  { %v1002_v39 = vsel %vm986_vm2, %v2222_v38, 0.0 }
 0x1b9   :  { %1003 = vadd.xlane.f32.xlu1 %v1002_v39 }
 0x22a   :  { %v1001_v1 = vpop.xlane.xlu1 %1000 }
 0x22b   :  { %2223 = vrcp.f32 %v1001_v1 }
 0x238   :  { %v2224_v40 = vpop.eup %2223 }
 0x239   :  { %v1006_v42 = vmul.f32 %v2224_v40, %v2220_v24 }
 0x23b   :  { %v1010_v46 = vsel %vm986_vm2, %v1006_v42, 0  ;;  %1935 = vst.msk [vmem:[#allocation8] sm:$0xff] %vm986_vm2, %v1006_v42 }
 0x23c   :  { %v1079_v47 = vand.u32 4294901760, %v1010_v46 }
 0x23e   :  { %v1080_v50 = vsub.f32 %v1010_v46, %v1079_v47  ;;  %2139 = vmatmul.mubr.f32.vlgmr.msra.gmra.mxu1 %v1079_v47 }
 0x23f   :  { %2149 = vmatpush3.msra.mxu1 %v2446_v43  ;;  %2152 = vmatprep.mubr.msk.f32.mxu1 %vm2320_vm0, %v2319_v0 }
 0x240   :  { %2150 = vmatprep.subr.mxu1 %v2319_v0  ;;  %v1081_v20 = vand.u32 4294901760, %v1080_v50 }
 0x241   :  { %2151 = vmatpush3.msra.mxu1 %v2454_v44 }
 0x242   :  { %2153 = vmatmul.mubr.f32.vlgmr.msra.gmra.mxu1 %v1081_v20  ;;  %2162 = vmatprep.subr.mxu1 %v2319_v0  ;;  %v1004_v25 = vpop.xlane.xlu1 %1003  ;;  %v1082_v53 = vsub.f32 %v1080_v50, %v1081_v20 }
 0x243   :  { %2225 = vrcp.f32 %v1004_v25  ;;  %2163 = vmatpush3.msra.mxu1 %v2446_v43  ;;  %2166 = vmatprep.mubr.msk.f32.mxu1 %vm2320_vm0, %v2319_v0  ;;  %v1591_v43 = vand.u32 4294901760, %v1590_v56 }
 0x244   :  { %2164 = vmatprep.subr.mxu1 %v2319_v0  ;;  %v1083_v54 = vand.u32 4294901760, %v1082_v53 }
 0x245   :  { %2165 = vmatpush3.msra.mxu1 %v2454_v44 }
 0x246   :  { %2132 = vmatmul.mubr.f32.vlgmr.msra.gmra.mxu0 %v1083_v54  ;;  %2167 = vmatmul.mubr.f32.vlgmr.msra.gmra.mxu1 %v1079_v47 }
 0x247   :  { %2142 = vmatpush3.msra.mxu0 %v1119_v30  ;;  %2145 = vmatprep.mubr.msk.f32.mxu0 %vm2320_vm0, %v2319_v0 }
 0x248   :  { %2143 = vmatprep.subr.mxu0 %v2319_v0  ;;  %2176 = vmatprep.subr.mxu1 %v2319_v0 }
 0x249   :  { %2144 = vmatpush3.msra.mxu0 %v1126_v31  ;;  %2177 = vmatpush3.msra.mxu1 %v1584_v55 }
 0x24a   :  { %2146 = vmatmul.mubr.f32.vlgmr.msra.gmra.mxu0 %v1080_v50  ;;  %2155 = vmatprep.subr.mxu0 %v2319_v0 }
 0x24b   :  { %2156 = vmatpush3.msra.mxu0 %v1120_v32  ;;  %2159 = vmatprep.mubr.msk.f32.mxu0 %vm2320_vm0, %v2319_v0 }
 0x24c   :  { %2157 = vmatprep.subr.mxu0 %v2319_v0  ;;  %2178 = vmatprep.subr.mxu1 %v2319_v0 }
 0x24d   :  { %2158 = vmatpush3.msra.mxu0 %v1127_v33  ;;  %2179 = vmatpush3.msra.mxu1 %v1591_v43 }
 0x24e   :  { %2160 = vmatmul.mubr.f32.vlgmr.msra.gmra.mxu0 %v1079_v47  ;;  %2180 = vmatprep.mubr.msk.f32.mxu1 %vm2320_vm0, %v2319_v0 }
 0x24f   :  { %2190 = vmatprep.subr.mxu1 %v2319_v0  ;;  %2169 = vmatprep.subr.mxu0 %v2319_v0 }
 0x250   :  { %v2226_v44 = vpop.eup %2225  ;;  %2170 = vmatpush3.msra.mxu0 %v2478_v2  ;;  %2173 = vmatprep.mubr.msk.f32.mxu0 %vm2320_vm0, %v2319_v0 }
 0x251   :  { %v1008_v57 = vmul.f32 %v2226_v44, %v2222_v38  ;;  %2171 = vmatprep.subr.mxu0 %v2319_v0 }
 0x252   :  { %2172 = vmatpush3.msra.mxu0 %v2481_v41 }
 0x253   :  { %v1472_v58 = vsel %vm986_vm2, %v1008_v57, 0  ;;  %1936 = vst.msk [vmem:[#allocation8 + $0x8] sm:$0xff] %vm986_vm2, %v1008_v57  ;;  %2183 = vmatprep.subr.mxu0 %v2319_v0 }
 0x254   :  { %v1541_v59 = vand.u32 4294901760, %v1472_v58 }
 0x256   :  { %v1542_v60 = vsub.f32 %v1472_v58, %v1541_v59  ;;  %2181 = vmatmul.mubr.f32.vlgmr.msra.gmra.mxu1 %v1541_v59 }
 0x257   :  { %2191 = vmatpush3.msra.mxu1 %v2478_v2  ;;  %2194 = vmatprep.mubr.msk.f32.mxu1 %vm2320_vm0, %v2319_v0 }
 0x258   :  { %2192 = vmatprep.subr.mxu1 %v2319_v0  ;;  %v1543_v61 = vand.u32 4294901760, %v1542_v60 }
 0x259   :  { %2193 = vmatpush3.msra.mxu1 %v2481_v41 }
 0x25a   :  { %2195 = vmatmul.mubr.f32.vlgmr.msra.gmra.mxu1 %v1543_v61  ;;  %2204 = vmatprep.subr.mxu1 %v2319_v0  ;;  %v1544_v62 = vsub.f32 %v1542_v60, %v1543_v61 }
 0x25b   :  { %2205 = vmatpush3.msra.mxu1 %v2478_v2  ;;  %2208 = vmatprep.mubr.msk.f32.mxu1 %vm2320_vm0, %v2319_v0 }
 0x25c   :  { %2206 = vmatprep.subr.mxu1 %v2319_v0  ;;  %v1545_v63 = vand.u32 4294901760, %v1544_v62 }
 0x25d   :  { %2207 = vmatpush3.msra.mxu1 %v2481_v41 }
 0x25e   :  { %2174 = vmatmul.mubr.f32.vlgmr.msra.gmra.mxu0 %v1545_v63  ;;  %2209 = vmatmul.mubr.f32.vlgmr.msra.gmra.mxu1 %v1541_v59 }
 0x25f   :  { %2184 = vmatpush3.msra.mxu0 %v2485_v45  ;;  %2187 = vmatprep.mubr.msk.f32.mxu0 %vm2320_vm0, %v2319_v0 }
 0x260   :  { %2185 = vmatprep.subr.mxu0 %v2319_v0 }
 0x261   :  { %2186 = vmatpush3.msra.mxu0 %v2492_v49 }
 0x262   :  { %2197 = vmatprep.subr.mxu0 %v2319_v0  ;;  %2188 = vmatmul.mubr.f32.vlgmr.msra.gmra.mxu0 %v1542_v60 }
 0x263   :  { %2198 = vmatpush3.msra.mxu0 %v1582_v48  ;;  %2201 = vmatprep.mubr.msk.f32.mxu0 %vm2320_vm0, %v2319_v0 }
 0x264   :  { %2199 = vmatprep.subr.mxu0 %v2319_v0 }
 0x265   :  { %2200 = vmatpush3.msra.mxu0 %v1589_v52 }
 0x266   :  { %2202 = vmatmul.mubr.f32.vlgmr.msra.gmra.mxu0 %v1541_v59 }
 0x267   :  { %2278 = shalt.err (!%p2275_p0)
}
 0x268   :  { %1960 = dma.vmem_to_hbm [thread:$0]  %s1955_s1, 256, %s2574_s3, [#allocation9], %s2316_s15, %s2316_s15, %s2317_s16  }
 0x269   :  { %s2322_s3 = smov [#allocation7]  }
 0x26a   :  { %s1942_s27 = sshll.u32 %s2322_s3, 4  ;;  %s1943_s27 = int_to_ptr.vmem [resolvable:$true] %s1942_s27 }
 0x26b   :  { %s2287_s28 = scalar_lea.vmem %s1943_s27, 256  ;;  %p2292_p2 = scmp.lt.s32.totalorder %s1943_s27, %s1943_s27 }
 0x26c   :  { %p2288_p1 = scmp.ne.s32.totalorder %s1943_s27, %s2287_s28  ;;  %p2293_p3 = scmp.lt.s32.totalorder %s2287_s28, %s2287_s28 }
 0x26e   :  { %p2294_p4 = por %p2293_p3, %p2292_p2 }
 0x270   :  { %p2295_p5 = pnand %p2294_p4, %p2288_p1 }
 0x2fe   :  { %v1166_v0 = vpop.f32.mrf.mxu1 }
 0x300   :  { %v2140_v3 = vpop.f32.mrf.mxu1 }
 0x302   :  { %v1317_v4 = vpop.f32.mrf.mxu1 }
 0x304   :  { %v2154_v5 = vpop.f32.mrf.mxu1 }
 0x306   :  { %v1085_v6 = vpop.f32.mrf.mxu0  ;;  %v1467_v7 = vpop.f32.mrf.mxu1 }
 0x307   :  { %v1167_v10 = vadd.f32 %v1166_v0, %v1085_v6 }
 0x308   :  { %v2133_v8 = vpop.f32.mrf.mxu0  ;;  %v2168_v9 = vpop.f32.mrf.mxu1 }
 0x30a   :  { %v1242_v11 = vpop.f32.mrf.mxu0 }
 0x30b   :  { %v1243_v12 = vadd.f32 %v1242_v11, %v1167_v10 }
 0x30c   :  { %v2147_v13 = vpop.f32.mrf.mxu0 }
 0x30d   :  { %v1318_v14 = vadd.f32 %v1317_v4, %v1243_v12 }
 0x30e   :  { %v1394_v15 = vpop.f32.mrf.mxu0 }
 0x30f   :  { %v1395_v16 = vadd.f32 %v1394_v15, %v1318_v14 }
 0x310   :  { %v2161_v17 = vpop.f32.mrf.mxu0 }
 0x311   :  { %v1468_v18 = vadd.f32 %v1467_v7, %v1395_v16 }
 0x313   :  { %1933 = vst.msk [vmem:[#allocation7] sm:$0xff] %vm49_vm1, %v1468_v18 }
 0x316   :  { %v1628_v19 = vpop.f32.mrf.mxu1 }
 0x318   :  { %v2182_v21 = vpop.f32.mrf.mxu1 }
 0x31a   :  { %v1779_v22 = vpop.f32.mrf.mxu1 }
 0x31c   :  { %v2196_v23 = vpop.f32.mrf.mxu1 }
 0x31e   :  { %v1547_v24 = vpop.f32.mrf.mxu0  ;;  %v1929_v26 = vpop.f32.mrf.mxu1 }
 0x31f   :  { %v1629_v29 = vadd.f32 %v1628_v19, %v1547_v24 }
 0x320   :  { %v2175_v27 = vpop.f32.mrf.mxu0  ;;  %v2210_v28 = vpop.f32.mrf.mxu1 }
 0x322   :  { %v1704_v30 = vpop.f32.mrf.mxu0 }
 0x323   :  { %v1705_v31 = vadd.f32 %v1704_v30, %v1629_v29 }
 0x324   :  { %v2189_v32 = vpop.f32.mrf.mxu0 }
 0x325   :  { %v1780_v33 = vadd.f32 %v1779_v22, %v1705_v31 }
 0x326   :  { %v1856_v34 = vpop.f32.mrf.mxu0 }
 0x327   :  { %v1857_v35 = vadd.f32 %v1856_v34, %v1780_v33 }
 0x328   :  { %v2203_v36 = vpop.f32.mrf.mxu0 }
 0x329   :  { %v1930_v37 = vadd.f32 %v1929_v26, %v1857_v35 }
 0x32b   :  { %1934 = vst.msk [vmem:[#allocation7 + $0x8] sm:$0xff] %vm49_vm1, %v1930_v37 }
 0x32c   :  { %2298 = shalt.err (!%p2295_p5)
}
 0x32d   :  { %1948 = dma.vmem_to_hbm [thread:$0]  %s1943_s27, 256, %s2573_s2, [#allocation4], %s2316_s15, %s2316_s15, %s2317_s16  }
 0x32e   :  { %2311 = dma.done.wait [#allocation4], 256  }
 0x32f   :  { %2312 = vsyncadd [#allocation4], 4294967040 }
 0x330   :  { %2313 = dma.done.wait [#allocation9], 256  }
 0x331   :  { %2314 = vsyncadd [#allocation9], 4294967040 }
 0x332   :  { %1967 = vsyncpa [#allocation3], 1 }
 0x333   :  { %1968 = vsyncpa [#allocation6], 1 }
 0x334   :  { %1969 = vsyncpa [#allocation4], 1 }
 0x335   :  { %1970 = vsyncpa [#allocation9], 1 }

</bundles_post_ra>
